<compile_context>
chip_gen: v7x
topology: tpu7x:2x2x1
jax: 0.10.0
libtpu: 0.0.40
codegen_flags: <defaults>
</compile_context>

<pallas_src>
import functools

import jax
import jax.numpy as jnp
from jax.experimental import pallas as pl
from jax.experimental.pallas import tpu as pltpu


def _round_up(n: int, m: int) -> int:
    return ((n + m - 1) // m) * m


def _sublane_multiple(dtype) -> int:
    # Full packed-sublane tile height: f32 -> 8, bf16 -> 16, int8/fp8 -> 32.
    return max(8, 32 // jnp.dtype(dtype).itemsize)


def _vmem_limit_bytes() -> int:
    try:
        cap = int(pltpu.get_tpu_info().vmem_capacity_bytes)
    except Exception:
        cap = 64 * 1024 * 1024  # conservative fallback: v7x per-TC VMEM
    # ~75% of physical (48 MiB on v7x, 96 MiB on v5e/v6e): headroom for
    # compiler scratch so double-buffering never gets serialized.
    return max(32 * 1024 * 1024, min((cap * 3) // 4, 112 * 1024 * 1024))


def _wn_head_kernel(x_ref, v_ref, s_ref, o_ref, *, block_c: int):
    """Compute one (TM, TN) logits tile.

    x_ref: (TM, D) pre-normalized inputs; v_ref: (TN, D) raw weight_v rows
    (stationary across the inner batch axis); s_ref: (1, C_pad) f32 per-class
    scale g/||v|| (fully VMEM-resident); o_ref: (TM, TN) logits tile.
    """
    x = x_ref[...]
    v = v_ref[...]
    if x.dtype != v.dtype:
        common = jnp.promote_types(x.dtype, v.dtype)
        x = x.astype(common)
        v = v.astype(common)

    # logits_raw = x @ v.T : contract D with D directly on the MXU (no
    # materialized transpose, no (TN, D) elementwise scaling of weights).
    acc = jax.lax.dot_general(
        x,
        v,
        dimension_numbers=(((1,), (1,)), ((), ())),
        preferred_element_type=jnp.float32,
    )  # (TM, TN) f32 accumulator

    # Epilogue: slice this class tile's columns out of the resident scale
    # vector (128-aligned start) and apply a single fused per-column multiply.
    col0 = pl.multiple_of(pl.program_id(0) * block_c, 128)
    s = s_ref[:, pl.ds(col0, block_c)]  # (1, TN) f32
    o_ref[...] = (acc * s).astype(o_ref.dtype)


def make_wn_classification_head(
    weight_v,
    weight_g,
    *,
    normalize: bool = True,
    block_b: int = 256,
    block_c: int = 512,
):
    """Build a cached forward for the weight-normalized classification head.

    weight_v: (C, D) raw weight_norm `v` (== Linear.weight rows).
    weight_g: (C,) or (C, 1) weight_norm `g` (frozen in the module).

    All weight-side work (per-class scale g/||v||, padding to tile multiples)
    happens once here; each forward call only streams x, weight_v and logits.
    """
    C, D = weight_v.shape
    w_itemsize = jnp.dtype(weight_v.dtype).itemsize

    # s = g / ||v||, lane-dense (1, C) f32.  W_eff is never materialized.
    v32 = weight_v.astype(jnp.float32)
    g32 = weight_g.astype(jnp.float32).reshape(C)
    scale = (g32 * jax.lax.rsqrt(jnp.sum(v32 * v32, axis=-1))).reshape(1, C)

    # Class-tile size: lane-dense multiple of 128, capped so one (TN, D) weight
    # buffer stays <= ~8 MiB (double-buffering fits v7x's 64 MiB VMEM).
    max_tn = max(128, ((8 * 1024 * 1024) // max(1, D * w_itemsize)) // 128 * 128)
    TN = max(128, min(block_c, _round_up(C, 128), max_tn))
    C_pad = _round_up(C, TN)

    # Pad weights/scale ONCE.  NOTE: keep these two pads coupled — padded v
    # rows (zeros) times padded s entries (zeros) give exactly-zero logits in
    # the padded class columns, which are sliced off below.
    v_p = jnp.pad(weight_v, ((0, C_pad - C), (0, 0))) if C_pad != C else weight_v
    s_p = jnp.pad(scale, ((0, 0), (0, C_pad - C))) if C_pad != C else scale
    v_p = jax.device_put(v_p)
    s_p = jax.device_put(s_p)

    vmem_limit = _vmem_limit_bytes()
    kernel = functools.partial(_wn_head_kernel, block_c=TN)

    def _forward(x, v_pad, s_pad):
        B, Dx = x.shape
        assert Dx == D, "feature dims must match"

        if normalize:
            # L2-normalize x ONCE per call (hoisted out of the class-tile
            # loop), f32 rsqrt on the EUP, cast back so bf16 inputs hit the
            # bf16 MXU path.
            # TODO(synk): no eps on the norm (matches the PyTorch module
            # exactly) — an all-zero input row yields non-finite logits, as in
            # torch.  Batch padding is applied AFTER normalization so padded
            # rows remain exactly zero (no NaNs in the padded region).
            x32 = x.astype(jnp.float32)
            inv = jax.lax.rsqrt(jnp.sum(x32 * x32, axis=-1, keepdims=True))
            xn = (x32 * inv).astype(x.dtype)
        else:
            xn = x

        # Batch-tile size: multiple of the packed-sublane height for x's dtype
        # (8 f32 / 16 bf16 / 32 int8) so bf16 tiles are fully packed; default
        # 256 fills the v6e/v7x 256x256 MXU M dimension.
        row_mult = _sublane_multiple(x.dtype)
        TM = min(_round_up(block_b, row_mult), _round_up(B, row_mult))
        B_pad = _round_up(B, TM)
        x_p = jnp.pad(xn, ((0, B_pad - B), (0, 0))) if B_pad != B else xn

        grid = (C_pad // TN, B_pad // TM)  # class tiles outer, batch tiles inner

        out_itemsize = jnp.dtype(x.dtype).itemsize
        cost = pl.CostEstimate(
            flops=2 * B_pad * C_pad * D,
            transcendentals=0,
            bytes_accessed=(
                B_pad * D * out_itemsize      # x (single pass, weight-stationary)
                + C_pad * D * w_itemsize      # weight_v (single pass)
                + C_pad * 4                   # per-class scale
                + B_pad * C_pad * out_itemsize  # logits
            ),
        )

        out = pl.pallas_call(
            kernel,
            out_shape=jax.ShapeDtypeStruct((B_pad, C_pad), x.dtype),
            grid_spec=pltpu.PrefetchScalarGridSpec(
                num_scalar_prefetch=0,
                grid=grid,
                in_specs=[
                    # x tile: re-fetched per class tile (small: TM*D elements).
                    pl.BlockSpec((TM, D), lambda j, i: (i, 0)),
                    # weight_v tile: block index depends only on the OUTER axis
                    # -> stays VMEM-resident across all inner batch tiles.
                    pl.BlockSpec((TN, D), lambda j, i: (j, 0)),
                    # per-class scale: single block, fully VMEM-resident.
                    pl.BlockSpec((1, C_pad), lambda j, i: (0, 0)),
                ],
                out_specs=pl.BlockSpec((TM, TN), lambda j, i: (i, j)),
            ),
            compiler_params=pltpu.CompilerParams(
                # Both axes independent; the outer (class) axis shards across
                # the two TensorCores on v7x / megacore on v6e.
                dimension_semantics=("parallel", "parallel"),
                vmem_limit_bytes=vmem_limit,
            ),
            cost_estimate=cost,
        )(x_p, v_pad, s_pad)

        return out[:B, :C]

    _forward_jit = jax.jit(_forward)

    def forward(x):
        return _forward_jit(x, v_p, s_p)

    return forward


def wn_classification_head(x, weight_v, weight_g, *, normalize=True,
                           block_b=256, block_c=512):
    """One-shot convenience wrapper (prefer the factory to cache weight prep)."""
    head = make_wn_classification_head(
        weight_v, weight_g, normalize=normalize, block_b=block_b, block_c=block_c)
    return head(x)


def _reference(x, weight_v, weight_g, normalize=True):
    x32 = x.astype(jnp.float32)
    v32 = weight_v.astype(jnp.float32)
    g32 = weight_g.astype(jnp.float32).reshape(-1, 1)
    xn = x32 / jnp.linalg.norm(x32, axis=-1, keepdims=True) if normalize else x32
    w = v32 * (g32 / jnp.linalg.norm(v32, axis=-1, keepdims=True))
    return xn @ w.T


if __name__ == "__main__":
    key = jax.random.PRNGKey(0)
    k_x, k_w, k_x2, k_w2 = jax.random.split(key, 4)

    # --- f32 smoke test (small shapes consistent with the module) -----------
    B, D, C = 8, 32, 16
    x = jax.random.normal(k_x, (B, D), dtype=jnp.float32)
    weights = jax.random.normal(k_w, (D, C), dtype=jnp.float32)   # (input, output) as given to __init__
    weight_v = weights.T                                          # (C, D) = linear.weight
    # weight_norm init: g = ||v|| per output row, shape (C, 1); frozen in the module.
    weight_g = jnp.linalg.norm(weight_v, axis=-1, keepdims=True)

    head = make_wn_classification_head(weight_v, weight_g)
    logits = head(x)
    jax.block_until_ready(logits)

    ref = _reference(x, weight_v, weight_g)
    assert logits.shape == (B, C)
    assert jnp.allclose(logits, ref, atol=1e-3, rtol=1e-3), "f32 mismatch vs reference"

    # --- bf16 test exercising multiple class / batch tiles -------------------
    B2, D2, C2 = 24, 64, 200
    x2 = jax.random.normal(k_x2, (B2, D2), dtype=jnp.bfloat16)
    v2 = jax.random.normal(k_w2, (C2, D2), dtype=jnp.bfloat16)
    g2 = jnp.linalg.norm(v2.astype(jnp.float32), axis=-1, keepdims=True).astype(jnp.bfloat16)

    head2 = make_wn_classification_head(v2, g2, block_b=16, block_c=128)
    logits2 = head2(x2)
    jax.block_until_ready(logits2)

    ref2 = _reference(x2, v2, g2)
    assert logits2.shape == (B2, C2)
    # Normalized x is cast back to bf16 before the MXU, so compare loosely
    # against the all-f32 reference.
    assert jnp.allclose(logits2.astype(jnp.float32), ref2, atol=1e-1, rtol=1e-1), \
        "bf16 mismatch vs reference"

    print("KERNEL_OK")
</pallas_src>

<mosaic_0001>
module attributes {stable_mosaic.version = 11 : i64} {
  func.func @_wn_head_kernel(%arg0: i32, %arg1: i32, %arg2: memref<8x32xf32, #tpu.memory_space<vmem>>, %arg3: memref<128x32xf32, #tpu.memory_space<vmem>>, %arg4: memref<1x128xf32, #tpu.memory_space<vmem>>, %arg5: memref<8x128xf32, #tpu.memory_space<vmem>>) attributes {dimension_semantics = [#tpu.dimension_semantics<parallel>, #tpu.dimension_semantics<parallel>], iteration_bounds = array<i64: 1, 1>, scalar_prefetch = 0 : i64, scratch_operands = 0 : i64, tpu.core_type = #tpu.core_type<tc>, window_params = [{transform_indices = @transform_0, window_bounds = array<i64: 8, 32>}, {transform_indices = @transform_1, window_bounds = array<i64: 128, 32>}, {pipeline_mode = #tpu.pipeline_mode<synchronous>, transform_indices = @transform_2, window_bounds = array<i64: 1, 128>}, {transform_indices = @transform_3, window_bounds = array<i64: 8, 128>}]} {
    %c0 = arith.constant 0 : index
    %c0_0 = arith.constant 0 : index
    %0 = vector.load %arg2[%c0, %c0_0] : memref<8x32xf32, #tpu.memory_space<vmem>>, vector<8x32xf32>
    %c0_1 = arith.constant 0 : index
    %c0_2 = arith.constant 0 : index
    %1 = vector.load %arg3[%c0_1, %c0_2] : memref<128x32xf32, #tpu.memory_space<vmem>>, vector<128x32xf32>
    %cst = arith.constant dense<0.000000e+00> : vector<8x128xf32>
    %2 = tpu.matmul %0, %1, %cst {dimension_numbers = #tpu.dot_dimension_numbers<[1], [1], [0], [0], [0, 0, 1, 0], [], []>} : vector<8x32xf32>, vector<128x32xf32>, vector<8x128xf32> -> vector<8x128xf32>
    %c128_i32 = arith.constant 128 : i32
    %3 = arith.muli %arg0, %c128_i32 : i32
    %4 = tpu.assume_multiple %3, 128 : i32
    %c0_3 = arith.constant 0 : index
    %5 = arith.index_cast %4 : i32 to index
    %6 = vector.load %arg4[%c0_3, %5] : memref<1x128xf32, #tpu.memory_space<vmem>>, vector<1x128xf32>
    %7 = vector.broadcast %6 : vector<1x128xf32> to vector<8x128xf32>
    %8 = arith.mulf %2, %7 : vector<8x128xf32>
    %c0_4 = arith.constant 0 : index
    %c0_5 = arith.constant 0 : index
    %9 = vector.load %arg5[%c0_4, %c0_5] : memref<8x128xf32, #tpu.memory_space<vmem>>, vector<8x128xf32>
    tpu.vector_store %arg5[%c0_4, %c0_5], %8 {strides = array<i32>} : memref<8x128xf32, #tpu.memory_space<vmem>>, vector<8x128xf32>,
    return
  }
  func.func @transform_0(%arg0: i32, %arg1: i32) -> (i32, i32) {
    %c0_i32 = arith.constant 0 : i32
    %c0_i32_0 = arith.constant 0 : i32
    return %arg1, %c0_i32 : i32, i32
  }
  func.func @transform_1(%arg0: i32, %arg1: i32) -> (i32, i32) {
    %c0_i32 = arith.constant 0 : i32
    %c0_i32_0 = arith.constant 0 : i32
    return %arg0, %c0_i32 : i32, i32
  }
  func.func @transform_2(%arg0: i32, %arg1: i32) -> (i32, i32) {
    %c0_i32 = arith.constant 0 : i32
    %c0_i32_0 = arith.constant 0 : i32
    %c0_i32_1 = arith.constant 0 : i32
    return %c0_i32, %c0_i32_0 : i32, i32
  }
  func.func @transform_3(%arg0: i32, %arg1: i32) -> (i32, i32) {
    %c0_i32 = arith.constant 0 : i32
    return %arg1, %arg0 : i32, i32
  }
}

</mosaic_0001>

<bundles_post_ra>
// kernel: _forward.1
= control target key start
LH: loop header
LB: loop body
LE: loop exit
PB: predicated region body
PF: predicated region fallthrough
CT: control target
= control target key end

     0   :  { %vm32_vm0 = vcmask 261120   ;;  %v312_v2 = vmov 0.0|0.0   ;;  %vm313_vm2 = vmmov 0   ;;  %v314_v5 = vmov 0.0   ;;  %s425_s0 = inlined_call_operand.vmem [shape: f32[8,32], index: 0, kind: input, shape index: {}]   ;;  %s426_s1 = inlined_call_operand.vmem [shape: f32[128,32], index: 1, kind: input, shape index: {}]   ;;  %s427_s2 = inlined_call_operand.vmem [shape: f32[1,128], index: 2, kind: input, shape index: {}]   ;;  %s428_s3 = inlined_call_operand.hbm [shape: f32[8,128], index: 3, kind: output, shape index: {}]  }
   0x1   :  { %v16_v0 = vld [vmem:[%s426_s1] sm:$0xff]  ;;  %v17_v1 = vld [vmem:[%s426_s1 + $0x8] sm:$0xff]  ;;  %252 = vmatprep.subr.bf16.mxu0 %v312_v2  ;;  %vm344_vm1 = vmpackc.low %vm32_vm0, %vm32_vm0  ;;  %249 = vmatprep.mubr.msk.f32.mxu0 %vm313_vm2, %v314_v5 }
   0x2   :  { %v253_v3 = vpack.c.bf16 %v17_v1, %v16_v0  ;;  %v18_v6 = vld [vmem:[%s426_s1 + $0x10] sm:$0xff]  ;;  %v19_v7 = vld [vmem:[%s426_s1 + $0x18] sm:$0xff] }
   0x4   :  { %255 = vmatpush3.bf16.xpose.msk.msra.mxu0 %vm344_vm1, %v253_v3 }
   0x5   :  { %256 = vmatprep.subr.bf16.mxu0 %v312_v2 }
   0x6   :  { %8 = vsyncpa [#allocation3], 0  ;;  %v257_v8 = vpack.c.bf16 %v19_v7, %v18_v6  ;;  %v20_v9 = vld [vmem:[%s426_s1 + $0x20] sm:$0xff]  ;;  %v21_v10 = vld [vmem:[%s426_s1 + $0x28] sm:$0xff]  ;;  %s315_s21 = smov [#allocation2]  }
   0x7   :  { %v261_v11 = vpack.c.bf16 %v21_v10, %v20_v9  ;;  %v22_v12 = vld [vmem:[%s426_s1 + $0x30] sm:$0xff]  ;;  %v23_v13 = vld [vmem:[%s426_s1 + $0x38] sm:$0xff]  ;;  %v24_v15 = vld [vmem:[%s426_s1 + $0x40] sm:$0xff]  ;;  %s173_s22 = sshll.u32 %s315_s21, 4  ;;  %s174_s22 = int_to_ptr.vmem [resolvable:$true] %s173_s22 }
   0x8   :  { %v265_v14 = vpack.c.bf16 %v23_v13, %v22_v12  ;;  %v25_v16 = vld [vmem:[%s426_s1 + $0x48] sm:$0xff]  ;;  %v26_v18 = vld [vmem:[%s426_s1 + $0x50] sm:$0xff]  ;;  %v27_v19 = vld [vmem:[%s426_s1 + $0x58] sm:$0xff]  ;;  %p293_p1 = scmp.lt.s32.totalorder %s174_s22, %s174_s22 }
   0x9   :  { %v269_v17 = vpack.c.bf16 %v25_v16, %v24_v15  ;;  %v273_v20 = vpack.c.bf16 %v27_v19, %v26_v18  ;;  %v28_v21 = vld [vmem:[%s426_s1 + $0x60] sm:$0xff]  ;;  %v29_v22 = vld [vmem:[%s426_s1 + $0x68] sm:$0xff]  ;;  %v30_v24 = vld [vmem:[%s426_s1 + $0x70] sm:$0xff] }
   0xa   :  { %v277_v23 = vpack.c.bf16 %v29_v22, %v28_v21  ;;  %v31_v25 = vld [vmem:[%s426_s1 + $0x78] sm:$0xff]  ;;  %v15_v27 = vld [vmem:[%s425_s0] sm:$0xff]  ;;  %s288_s1 = scalar_lea.vmem %s174_s22, 128 }
   0xb   :  { %v281_v26 = vpack.c.bf16 %v31_v25, %v30_v24  ;;  %v199_v28 = vld [vmem:[%s427_s2] ss:$0 sm:$0xff]  ;;  %p289_p0 = scmp.ne.s32.totalorder %s174_s22, %s288_s1  ;;  %p294_p2 = scmp.lt.s32.totalorder %s288_s1, %s288_s1 }
   0xc   :  { %259 = vmatpush3.bf16.xpose.msk.msra.mxu0 %vm344_vm1, %v257_v8 }
   0xd   :  { %260 = vmatprep.subr.bf16.mxu0 %v312_v2  ;;  %p295_p3 = por %p294_p2, %p293_p1 }
   0xf   :  { %p296_p4 = pnand %p295_p3, %p289_p0 }
  0x14   :  { %263 = vmatpush3.bf16.xpose.msk.msra.mxu0 %vm344_vm1, %v261_v11 }
  0x15   :  { %264 = vmatprep.subr.bf16.mxu0 %v312_v2 }
  0x1c   :  { %267 = vmatpush3.bf16.xpose.msk.msra.mxu0 %vm344_vm1, %v265_v14 }
  0x1d   :  { %268 = vmatprep.subr.bf16.mxu0 %v312_v2 }
  0x24   :  { %271 = vmatpush3.bf16.xpose.msk.msra.mxu0 %vm344_vm1, %v269_v17 }
  0x25   :  { %272 = vmatprep.subr.bf16.mxu0 %v312_v2 }
  0x2c   :  { %275 = vmatpush3.bf16.xpose.msk.msra.mxu0 %vm344_vm1, %v273_v20 }
  0x2d   :  { %276 = vmatprep.subr.bf16.mxu0 %v312_v2 }
  0x34   :  { %279 = vmatpush3.bf16.xpose.msk.msra.mxu0 %vm344_vm1, %v277_v23 }
  0x35   :  { %280 = vmatprep.subr.bf16.mxu0 %v312_v2 }
  0x3c   :  { %283 = vmatpush3.bf16.xpose.msk.msra.mxu0 %vm344_vm1, %v281_v26 }
  0x43   :  { %250 = vmatmul.mubr.msk.f32.vlgmr.msra.gmra.mrb[0].mxu0 %vm32_vm0, %v15_v27 }
 0x116   :  { %v150_v29 = vpop.f32.mrb[0].mxu0 }
 0x117   :  { %v165_v30 = vmul.f32 %v199_v28, %v150_v29  ;;  %v251_v31 = vpop.f32.mrb[1].mxu0 }
 0x119   :  { %166 = vst [vmem:[#allocation2] sm:$0xff] %v165_v30 }
 0x11a   :  { %299 = shalt.err (!%p296_p4)
}
 0x11b   :  { %s300_s24 = scalar_lea.hbm %s428_s3, 128 }
 0x11c   :  { %p301_p5 = scmp.ne.s32.totalorder %s428_s3, %s300_s24  ;;  %p304_p6 = scmp.lt.u32.totalorder %s300_s24, %s428_s3 }
 0x11e   :  { %p306_p7 = pnand %p304_p6, %p301_p5 }
 0x120   :  { %309 = shalt.err (!%p306_p7)
}
 0x121   :  { %176 = dma.vmem_to_hbm [thread:$0]  %s174_s22, 128, %s428_s3, [#allocation3]  }
 0x122   :  { %310 = dma.done.wait [#allocation3], 128  }
 0x123   :  { %311 = vsyncadd [#allocation3], 4294967168 }
 0x124   :  { %180 = vsyncpa [#allocation3], 1 }

</bundles_post_ra>
